<compile_context>
chip_gen: v7x
topology: tpu7x:2x2x1
jax: 0.10.0
libtpu: 0.0.40
codegen_flags: <defaults>
</compile_context>

<pallas_src>
import jax
import jax.numpy as jnp
from jax import lax
from jax.experimental import pallas as pl
from jax.experimental.pallas import tpu as pltpu

NUM_ATTN = 64


# ---------------------------------------------------------------------------
# Kernel
# ---------------------------------------------------------------------------
def _attn_kernel(x_ref, w1_ref, b1_ref, w2_ref, out_ref):
    # x_ref:  (BB, T, H)    block of BB batch rows
    # w1_ref: (H, 64), b1_ref: (1, 64), w2_ref: (1, 64)
    # out_ref:(BB, T)       lane-dense softmax output (T on the lane axis)
    x = x_ref[...]  # keep input dtype (bf16 stays bf16 for the MXU)

    # Contract H directly on the 3-D block: (BB, T, H) x (H, 64) -> (BB, T, 64).
    # Avoids the reshape-to-(BB*T, H) relayout and accumulates in f32.
    h = lax.dot_general(
        x, w1_ref[...],
        dimension_numbers=(((2,), (0,)), ((), ())),
        preferred_element_type=jnp.float32,
    )
    h = jnp.maximum(h + b1_ref[...], 0.0)                      # bias + ReLU (VPU)

    # Linear(64 -> 1) as a VPU multiply + minor-axis reduce.
    scores = jnp.sum(h * w2_ref[...], axis=-1)                 # (BB, T), f32
    # NOTE: b2 intentionally omitted -- softmax over T is shift-invariant.

    # Softmax over T (lane-axis reductions on a dense tile).
    m = jnp.max(scores, axis=-1, keepdims=True)
    e = jnp.exp(scores - m)
    denom = jnp.sum(e, axis=-1, keepdims=True)
    inv = pl.reciprocal(denom, approx=False)                   # exact: 1e-5 check
    out_ref[...] = (e * inv).astype(out_ref.dtype)


# ---------------------------------------------------------------------------
# Block / VMEM planning
# ---------------------------------------------------------------------------
def _vmem_capacity_bytes():
    try:
        return int(pltpu.get_tpu_info().vmem_capacity_bytes)
    except Exception:
        return 64 * 1024 * 1024  # conservative (v7x per-TC physical VMEM)


def _plan(B, T, H, itemsize):
    """Return (BB, B_pad, vmem_limit_bytes).

    Per-grid-step resident bytes (what the budget must cover):
      2 * BB*T*H*itemsize        double-buffered input block
      1 * BB*T*64*4              f32 hidden activation h
      1 * BB*T*64*4              f32 temp for h*w2 / e / scores
      2 * BB*T*4                 double-buffered lane-dense output
    """
    cap = _vmem_capacity_bytes()
    budget = min(cap // 3, 20 * 1024 * 1024)           # generation-aware block budget
    vmem_limit = min(cap // 2, 64 * 1024 * 1024)        # scoped limit we request

    per_row = (2 * T * H * itemsize) + (2 * T * NUM_ATTN * 4) + (2 * T * 4)
    max_bb = max(1, budget // per_row)

    if B <= 8 and B <= max_bb:
        # Tiny batch: single full-batch block (BB == full dim satisfies the
        # output sublane constraint); padding to 2 steps would >2x the work.
        return B, B, vmem_limit

    # BB must be a multiple of 8 (output block second-to-last dim) and we want
    # >= 2 grid steps so "parallel" actually shards across v7x's 2 TCs.
    bb = min(max_bb, pl.cdiv(B, 2))
    bb = max(8, (bb // 8) * 8)
    # TODO(synk): if max_bb < 8 (huge T*H) tile T with an online softmax.
    b_pad = pl.cdiv(B, bb) * bb
    return bb, b_pad, vmem_limit


# ---------------------------------------------------------------------------
# Wrapper
# ---------------------------------------------------------------------------
def attn_forward(encoder_outputs, w1, b1, w2, b2=None):
    """encoder_outputs: (B, T, H) -> (B, T, 1), matching Attn.forward.

    `b2` is accepted for API parity but unused: a scalar shift before a
    softmax over T is a mathematical no-op for the forward output.
    """
    del b2
    B, T, H = encoder_outputs.shape
    in_dtype = encoder_outputs.dtype
    itemsize = jnp.dtype(in_dtype).itemsize

    BB, B_pad, vmem_limit = _plan(B, T, H, itemsize)

    x = encoder_outputs
    if B_pad != B:
        x = jnp.pad(x, ((0, B_pad - B), (0, 0), (0, 0)))

    grid = (B_pad // BB,)

    # Keep the matmul operands in the input dtype (bf16-native MXU path when
    # the activations are bf16); bias / projection vector stay f32 for the VPU.
    w1_k = w1.astype(in_dtype)
    b1_2d = b1.reshape(1, NUM_ATTN).astype(jnp.float32)
    w2_row = w2.reshape(1, NUM_ATTN).astype(jnp.float32)

    weight_bytes = (w1_k.size * jnp.dtype(w1_k.dtype).itemsize
                    + b1_2d.size * 4 + w2_row.size * 4)
    cost = pl.CostEstimate(
        flops=2 * B_pad * T * H * NUM_ATTN + 4 * B_pad * T * NUM_ATTN,
        transcendentals=B_pad * T,
        bytes_accessed=B_pad * T * H * itemsize + B_pad * T * itemsize
                       + weight_bytes,
    )

    out_bt = pl.pallas_call(
        _attn_kernel,
        out_shape=jax.ShapeDtypeStruct((B_pad, T), in_dtype),
        grid_spec=pltpu.PrefetchScalarGridSpec(
            num_scalar_prefetch=0,
            grid=grid,
            in_specs=[
                pl.BlockSpec((BB, T, H), lambda b: (b, 0, 0)),
                pl.BlockSpec((H, NUM_ATTN), lambda b: (0, 0)),
                pl.BlockSpec((1, NUM_ATTN), lambda b: (0, 0)),
                pl.BlockSpec((1, NUM_ATTN), lambda b: (0, 0)),
            ],
            out_specs=pl.BlockSpec((BB, T), lambda b: (b, 0)),
        ),
        compiler_params=pltpu.CompilerParams(
            dimension_semantics=("parallel",),
            vmem_limit_bytes=vmem_limit,
        ),
        cost_estimate=cost,
    )(x, w1_k, b1_2d, w2_row)

    if B_pad != B:
        out_bt = out_bt[:B]

    # unsqueeze(2) from the PyTorch module: pure layout plumbing in the wrapper.
    return out_bt[..., None]


# ---------------------------------------------------------------------------
# Pure-JAX reference
# ---------------------------------------------------------------------------
def attn_reference(encoder_outputs, w1, b1, w2, b2):
    B, T, H = encoder_outputs.shape
    tmp = encoder_outputs.reshape(-1, H)
    h = jnp.maximum(tmp @ w1 + b1, 0.0)
    scores = (h @ w2 + b2).reshape(B, T)
    return jax.nn.softmax(scores, axis=1)[..., None]


if __name__ == "__main__":
    B, T, H = 2, 8, 32

    key = jax.random.PRNGKey(0)
    kx, kw1, kb1, kw2, kb2 = jax.random.split(key, 5)

    x = jax.random.normal(kx, (B, T, H), dtype=jnp.float32)

    # Deterministic parameter init (mirrors nn.Linear uniform(-1/sqrt(fan_in), ...))
    lim1 = 1.0 / jnp.sqrt(jnp.float32(H))
    w1 = jax.random.uniform(kw1, (H, NUM_ATTN), jnp.float32, -lim1, lim1)
    b1 = jax.random.uniform(kb1, (NUM_ATTN,), jnp.float32, -lim1, lim1)
    lim2 = 1.0 / jnp.sqrt(jnp.float32(NUM_ATTN))
    w2 = jax.random.uniform(kw2, (NUM_ATTN, 1), jnp.float32, -lim2, lim2)
    b2 = jax.random.uniform(kb2, (1,), jnp.float32, -lim2, lim2)

    out = attn_forward(x, w1, b1, w2, b2)
    out = jax.block_until_ready(out)

    ref = attn_reference(x, w1, b1, w2, b2)
    assert out.shape == (B, T, 1)
    assert jnp.allclose(out, ref, atol=1e-5, rtol=1e-5), "mismatch vs reference"
    assert jnp.allclose(jnp.sum(out, axis=1), 1.0, atol=1e-5), "softmax not normalized"

    # Exercise the padded / multi-step path as well (B not a multiple of 8).
    B2 = 12
    x2 = jax.random.normal(kx, (B2, T, H), dtype=jnp.float32)
    out2 = jax.block_until_ready(attn_forward(x2, w1, b1, w2, b2))
    ref2 = attn_reference(x2, w1, b1, w2, b2)
    assert out2.shape == (B2, T, 1)
    assert jnp.allclose(out2, ref2, atol=1e-5, rtol=1e-5), "mismatch (padded path)"

    print("KERNEL_OK")
</pallas_src>

<mosaic_0001>
module attributes {stable_mosaic.version = 11 : i64} {
  func.func @_attn_kernel(%arg0: i32, %arg1: memref<2x8x32xf32, #tpu.memory_space<vmem>>, %arg2: memref<32x64xf32, #tpu.memory_space<vmem>>, %arg3: memref<1x64xf32, #tpu.memory_space<vmem>>, %arg4: memref<1x64xf32, #tpu.memory_space<vmem>>, %arg5: memref<2x8xf32, #tpu.memory_space<vmem>>) attributes {dimension_semantics = [#tpu.dimension_semantics<parallel>], iteration_bounds = array<i64: 1>, scalar_prefetch = 0 : i64, scratch_operands = 0 : i64, tpu.core_type = #tpu.core_type<tc>, window_params = [{transform_indices = @transform_0, window_bounds = array<i64: 2, 8, 32>}, {pipeline_mode = #tpu.pipeline_mode<synchronous>, transform_indices = @transform_1, window_bounds = array<i64: 32, 64>}, {pipeline_mode = #tpu.pipeline_mode<synchronous>, transform_indices = @transform_2, window_bounds = array<i64: 1, 64>}, {pipeline_mode = #tpu.pipeline_mode<synchronous>, transform_indices = @transform_3, window_bounds = array<i64: 1, 64>}, {transform_indices = @transform_4, window_bounds = array<i64: 2, 8>}]} {
    %c0 = arith.constant 0 : index
    %c0_0 = arith.constant 0 : index
    %c0_1 = arith.constant 0 : index
    %0 = vector.load %arg1[%c0, %c0_0, %c0_1] : memref<2x8x32xf32, #tpu.memory_space<vmem>>, vector<2x8x32xf32>
    %c0_2 = arith.constant 0 : index
    %c0_3 = arith.constant 0 : index
    %1 = vector.load %arg2[%c0_2, %c0_3] : memref<32x64xf32, #tpu.memory_space<vmem>>, vector<32x64xf32>
    %cst = arith.constant dense<0.000000e+00> : vector<2x8x64xf32>
    %2 = tpu.matmul %0, %1, %cst {dimension_numbers = #tpu.dot_dimension_numbers<[2], [0], [0, 1], [1], [0, 0, 0, 1, 1, 1], [], []>} : vector<2x8x32xf32>, vector<32x64xf32>, vector<2x8x64xf32> -> vector<2x8x64xf32>
    %c0_4 = arith.constant 0 : index
    %c0_5 = arith.constant 0 : index
    %3 = vector.load %arg3[%c0_4, %c0_5] : memref<1x64xf32, #tpu.memory_space<vmem>>, vector<1x64xf32>
    %4 = vector.shape_cast %3 : vector<1x64xf32> to vector<1x1x64xf32>
    %5 = vector.broadcast %4 : vector<1x1x64xf32> to vector<2x8x64xf32>
    %6 = arith.addf %2, %5 : vector<2x8x64xf32>
    %cst_6 = arith.constant 0.000000e+00 : f32
    %7 = vector.broadcast %cst_6 : f32 to vector<2x8x64xf32>
    %8 = arith.maximumf %6, %7 : vector<2x8x64xf32>
    %c0_7 = arith.constant 0 : index
    %c0_8 = arith.constant 0 : index
    %9 = vector.load %arg4[%c0_7, %c0_8] : memref<1x64xf32, #tpu.memory_space<vmem>>, vector<1x64xf32>
    %10 = vector.shape_cast %9 : vector<1x64xf32> to vector<1x1x64xf32>
    %11 = vector.broadcast %10 : vector<1x1x64xf32> to vector<2x8x64xf32>
    %12 = arith.mulf %8, %11 : vector<2x8x64xf32>
    %cst_9 = arith.constant dense<0.000000e+00> : vector<2x8xf32>
    %13 = vector.multi_reduction <add>, %12, %cst_9 [2] : vector<2x8x64xf32> to vector<2x8xf32>
    %cst_10 = arith.constant dense<0xFF800000> : vector<2xf32>
    %14 = vector.multi_reduction <maximumf>, %13, %cst_10 [1] : vector<2x8xf32> to vector<2xf32>
    %15 = vector.shape_cast %14 : vector<2xf32> to vector<2x1xf32>
    %16 = vector.broadcast %15 : vector<2x1xf32> to vector<2x8xf32>
    %17 = arith.subf %13, %16 : vector<2x8xf32>
    %18 = math.exp %17 : vector<2x8xf32>
    %cst_11 = arith.constant dense<0.000000e+00> : vector<2xf32>
    %19 = vector.multi_reduction <add>, %18, %cst_11 [1] : vector<2x8xf32> to vector<2xf32>
    %20 = vector.shape_cast %19 : vector<2xf32> to vector<2x1xf32>
    %21 = tpu.reciprocal %20 : vector<2x1xf32> -> vector<2x1xf32>
    %22 = vector.broadcast %21 : vector<2x1xf32> to vector<2x8xf32>
    %23 = arith.mulf %18, %22 : vector<2x8xf32>
    %c0_12 = arith.constant 0 : index
    %c0_13 = arith.constant 0 : index
    %24 = vector.load %arg5[%c0_12, %c0_13] : memref<2x8xf32, #tpu.memory_space<vmem>>, vector<2x8xf32>
    tpu.vector_store %arg5[%c0_12, %c0_13], %23 {strides = array<i32>} : memref<2x8xf32, #tpu.memory_space<vmem>>, vector<2x8xf32>,
    return
  }
  func.func @transform_0(%arg0: i32) -> (i32, i32, i32) {
    %c0_i32 = arith.constant 0 : i32
    %c0_i32_0 = arith.constant 0 : i32
    %c0_i32_1 = arith.constant 0 : i32
    return %arg0, %c0_i32, %c0_i32_0 : i32, i32, i32
  }
  func.func @transform_1(%arg0: i32) -> (i32, i32) {
    %c0_i32 = arith.constant 0 : i32
    %c0_i32_0 = arith.constant 0 : i32
    %c0_i32_1 = arith.constant 0 : i32
    return %c0_i32, %c0_i32_0 : i32, i32
  }
  func.func @transform_2(%arg0: i32) -> (i32, i32) {
    %c0_i32 = arith.constant 0 : i32
    %c0_i32_0 = arith.constant 0 : i32
    %c0_i32_1 = arith.constant 0 : i32
    return %c0_i32, %c0_i32_0 : i32, i32
  }
  func.func @transform_3(%arg0: i32) -> (i32, i32) {
    %c0_i32 = arith.constant 0 : i32
    %c0_i32_0 = arith.constant 0 : i32
    %c0_i32_1 = arith.constant 0 : i32
    return %c0_i32, %c0_i32_0 : i32, i32
  }
  func.func @transform_4(%arg0: i32) -> (i32, i32) {
    %c0_i32 = arith.constant 0 : i32
    %c0_i32_0 = arith.constant 0 : i32
    return %arg0, %c0_i32 : i32, i32
  }
}

</mosaic_0001>

<bundles_post_ra>
// kernel: tpu_custom_call.1
= control target key start
LH: loop header
LB: loop body
LE: loop exit
PB: predicated region body
PF: predicated region fallthrough
CT: control target
= control target key end

     0   :  { %9 = vsyncpa [#allocation3], 0  ;;  %s459_s0 = inlined_call_operand.hbm [shape: f32[2,8,32], index: 0, kind: input, shape index: {}]   ;;  %s460_s1 = inlined_call_operand.hbm [shape: f32[32,64], index: 1, kind: input, shape index: {}]   ;;  %s461_s2 = inlined_call_operand.vmem [shape: f32[1,64], index: 2, kind: input, shape index: {}]   ;;  %s462_s3 = inlined_call_operand.vmem [shape: f32[1,64], index: 3, kind: input, shape index: {}]   ;;  %s463_s4 = inlined_call_operand.hbm [shape: f32[2,8], index: 4, kind: output, shape index: {}]  }
   0x1   :  { %10 = vsyncpa [#allocation6], 0 }
   0x2   :  { %11 = vsyncpa [#allocation4], 0  ;;  %s380_s15 = smov [#allocation2]   ;;  %s308_s19 = scalar_lea.hbm %s459_s0, 256 }
   0x3   :  { %s17_s16 = sshll.u32 %s380_s15, 4  ;;  %p309_p0 = scmp.ne.s32.totalorder %s459_s0, %s308_s19  ;;  %s18_s16 = int_to_ptr.vmem [resolvable:$true] %s17_s16 }
   0x4   :  { %p312_p1 = scmp.lt.u32.totalorder %s308_s19, %s459_s0 }
   0x6   :  { %p314_p2 = pnand %p312_p1, %p309_p0 }
   0x8   :  { %317 = shalt.err (!%p314_p2)
}
   0x9   :  { %s318_s24 = scalar_lea.vmem %s18_s16, 256  ;;  %p323_p4 = scmp.lt.s32.totalorder %s18_s16, %s18_s16 }
   0xa   :  { %p319_p3 = scmp.ne.s32.totalorder %s18_s16, %s318_s24  ;;  %p324_p5 = scmp.lt.s32.totalorder %s318_s24, %s318_s24 }
   0xc   :  { %p325_p6 = por %p324_p5, %p323_p4 }
   0xe   :  { %p326_p7 = pnand %p325_p6, %p319_p3 }
  0x10   :  { %329 = shalt.err (!%p326_p7)
}
  0x11   :  { %s381_s25 = smov 128   ;;  %s382_s26 = smov 8  }
  0x12   :  { %23 = dma.hbm_to_vmem [thread:$0]  %s459_s0, 256, %s18_s16, [#allocation3], %s381_s25, %s381_s25, %s382_s26  }
  0x13   :  { %s383_s29 = smov [#allocation5]   ;;  %s330_s7 = scalar_lea.hbm %s460_s1, 512 }
  0x14   :  { %s29_s30 = sshll.u32 %s383_s29, 4  ;;  %p331_p8 = scmp.ne.s32.totalorder %s460_s1, %s330_s7  ;;  %s30_s30 = int_to_ptr.vmem [resolvable:$true] %s29_s30 }
  0x15   :  { %p334_p9 = scmp.lt.u32.totalorder %s330_s7, %s460_s1 }
  0x17   :  { %p336_p10 = pnand %p334_p9, %p331_p8 }
  0x19   :  { %339 = shalt.err (!%p336_p10)
}
  0x1a   :  { %s340_s12 = scalar_lea.vmem %s30_s30, 512  ;;  %p345_p12 = scmp.lt.s32.totalorder %s30_s30, %s30_s30 }
  0x1b   :  { %p341_p11 = scmp.ne.s32.totalorder %s30_s30, %s340_s12  ;;  %p346_p13 = scmp.lt.s32.totalorder %s340_s12, %s340_s12 }
  0x1d   :  { %p347_p0 = por %p346_p13, %p345_p12 }
  0x1f   :  { %p348_p1 = pnand %p347_p0, %p341_p11 }
  0x21   :  { %351 = shalt.err (!%p348_p1)
}
  0x22   :  { %35 = dma.hbm_to_vmem [thread:$0]  %s460_s1, 512, %s30_s30, [#allocation6], %s381_s25, %s381_s25, %s382_s26  }
  0x23   :  { %374 = dma.done.wait [#allocation3], 256  }
  0x24   :  { %375 = vsyncadd [#allocation3], 4294967040 }
  0x25   :  { %376 = dma.done.wait [#allocation6], 512  }
  0x26   :  { %377 = vsyncadd [#allocation6], 4294966784  ;;  %vm59_vm0 = vcmask 261120   ;;  %v48_v0 = vld [vmem:[#allocation5] sm:$0xff]  ;;  %v49_v1 = vld [vmem:[#allocation5 + $0x8] sm:$0xff]  ;;  %vm152_vm1 = vcmask 523264   ;;  %v161_v20 = vlaneseq }
  0x27   :  { %v50_v2 = vld [vmem:[#allocation5 + $0x10] sm:$0xff]  ;;  %v286_v3 = vpack.c.bf16 %v49_v1, %v48_v0  ;;  %v51_v4 = vld [vmem:[#allocation5 + $0x18] sm:$0xff]  ;;  %vm171_vm2 = vcmask 1041409   ;;  %vm174_vm3 = vcmask 58368   ;;  %v384_v30 = vmov 0  }
  0x28   :  { %v46_v5 = vld [vmem:[#allocation2] sm:$0xff]  ;;  %v290_v6 = vpack.c.bf16 %v51_v4, %v50_v2  ;;  %v47_v7 = vld [vmem:[#allocation2 + $0x8] sm:$0xff]  ;;  %v162_v21 = vand.u32 127, %v161_v20  ;;  %v164_v22 = vshrl.u32 %v161_v20, 7  ;;  %301 = vset.pattern.permute.xlu0 %v384_v30  ;;  %300 = vset.pattern.permute.xlu1 %v384_v30 }
  0x29   :  { %283 = vmatprep.mubr.msk.f32.mxu0 %vm59_vm0, %v46_v5  ;;  %287 = vmatprep.subr.bf16.mxu0 %v286_v3  ;;  %v265_v8 = vld [vmem:[%s461_s2] ss:$0 sm:$0xff]  ;;  %s385_s2 = smov [#allocation7]  }
  0x2a   :  { %289 = vmatpush3.bf16.msra.mxu0 %v286_v3  ;;  %v268_v13 = vld [vmem:[%s462_s3] ss:$0 sm:$0xff]  ;;  %v165_v24 = vsub.s32 %v162_v21, %v164_v22  ;;  %v181_v31 = vsub.s32 0, %v164_v22  ;;  %v185_v32 = vsub.s32 1, %v164_v22  ;;  %s255_s3 = sshll.u32 %s385_s2, 4  ;;  %s256_s3 = int_to_ptr.vmem [resolvable:$true] %s255_s3 }
  0x2b   :  { %291 = vmatprep.subr.bf16.mxu0 %v290_v6  ;;  %s352_s17 = scalar_lea.vmem %s256_s3, 32  ;;  %p357_p3 = scmp.lt.s32.totalorder %s256_s3, %s256_s3 }
  0x2c   :  { %p353_p2 = scmp.ne.s32.totalorder %s256_s3, %s352_s17  ;;  %p358_p4 = scmp.lt.s32.totalorder %s352_s17, %s352_s17 }
  0x2e   :  { %293 = vmatpush3.bf16.msra.mxu0 %v290_v6  ;;  %p359_p5 = por %p358_p4, %p357_p3 }
  0x30   :  { %p360_p6 = pnand %p359_p5, %p353_p2 }
  0x31   :  { %284 = vmatmul.mubr.msk.f32.vlgmr.msra.gmra.mrb[0].mxu0 %vm59_vm0, %v47_v7 }
 0x104   :  { %v285_v9 = vpop.f32.mrb[0].mxu0 }
 0x105   :  { %v138_v10 = vadd.f32 %v285_v9, %v265_v8  ;;  %v132_v11 = vpop.f32.mrb[1].mxu0 }
 0x106   :  { %v133_v12 = vadd.f32 %v265_v8, %v132_v11 }
 0x107   :  { %v142_v14 = vmax.f32 %v138_v10, 0.0 }
 0x108   :  { %v141_v15 = vmax.f32 %v133_v12, 0.0 }
 0x109   :  { %v151_v18 = vmul.f32 %v268_v13, %v142_v14 }
 0x10a   :  { %v150_v16 = vmul.f32 %v268_v13, %v141_v15 }
 0x10b   :  { %v156_v19 = vsel %vm152_vm1, %v151_v18, 0.0 }
 0x10c   :  { %v153_v17 = vsel %vm152_vm1, %v150_v16, 0.0 }
 0x10d   :  { %154 = vadd.xlane.f32.xlu0 %v153_v17 }
 0x111   :  { %157 = vadd.xlane.f32.xlu0 %v156_v19 }
 0x19a   :  { %v155_v23 = vpop.xlane.xlu0 %154 }
 0x19b   :  { %v166_v26 = vrot.slane %v155_v23, %v165_v24 }
 0x19e   :  { %v158_v25 = vpop.xlane.xlu0 %157 }
 0x19f   :  { %v170_v27 = vrot.slane %v158_v25, %v165_v24 }
 0x1a1   :  { %v172_v28 = vsel %vm171_vm2, %v170_v27, %v166_v26 }
 0x1a2   :  { %v175_v29 = vsel %vm174_vm3, %v172_v28, -inf }
 0x1a3   :  { %176 = vmax.xlane.f32.xlu1 %v175_v29 }
 0x230   :  { %v177_v33 = vpop.xlane.xlu1 %176 }
 0x231   :  { %v182_v34 = vrot.slane %v177_v33, %v181_v31  ;;  %v186_v35 = vrot.slane %v177_v33, %v185_v32 }
 0x233   :  { %v189_v36 = vsub.f32 %v155_v23, %v182_v34  ;;  %v190_v37 = vsub.f32 %v158_v25, %v186_v35 }
 0x235   :  { %v191_v38 = vmul.f32 1.442695, %v189_v36  ;;  %v193_v39 = vmul.f32 1.442695, %v190_v37 }
 0x237   :  { %302 = vpow2.f32 %v191_v38 }
 0x238   :  { %304 = vpow2.f32 %v193_v39 }
 0x241   :  { %v303_v40 = vpop.eup %302 }
 0x242   :  { %v305_v41 = vpop.eup %304  ;;  %198 = vperm.xlu1 %300, %v303_v40  }
 0x243   :  { %201 = vperm.xlu0 %301, %v305_v41  }
 0x2c1   :  { %v199_v42 = vpop.permute.xlu1 %198 }
 0x2c2   :  { %v202_v43 = vpop.permute.xlu0 %201  ;;  %v206_v44 = vrot.slane %v199_v42, %v165_v24 }
 0x2c3   :  { %v210_v45 = vrot.slane %v202_v43, %v165_v24 }
 0x2c5   :  { %v211_v46 = vsel %vm171_vm2, %v210_v45, %v206_v44 }
 0x2c6   :  { %v213_v47 = vsel %vm174_vm3, %v211_v46, 0.0 }
 0x2c7   :  { %214 = vadd.xlane.f32.xlu1 %v213_v47 }
 0x354   :  { %v215_v48 = vpop.xlane.xlu1 %214 }
 0x355   :  { %306 = vrcp.f32 %v215_v48 }
 0x35f   :  { %v307_v49 = vpop.eup %306 }
 0x360   :  { %v221_v50 = vrot.slane %v307_v49, %v181_v31  ;;  %v225_v52 = vrot.slane %v307_v49, %v185_v32 }
 0x362   :  { %v228_v51 = vmul.f32 %v303_v40, %v221_v50  ;;  %v229_v53 = vmul.f32 %v305_v41, %v225_v52 }
 0x364   :  { %233 = vperm.xlu0 %301, %v228_v51  }
 0x368   :  { %236 = vperm.xlu0 %301, %v229_v53  }
 0x3e3   :  { %v234_v54 = vpop.permute.xlu0 %233 }
 0x3e4   :  { %v241_v56 = vrot.slane %v234_v54, %v165_v24 }
 0x3e7   :  { %v237_v55 = vpop.permute.xlu0 %236 }
 0x3e8   :  { %v245_v57 = vrot.slane %v237_v55, %v165_v24 }
 0x3ea   :  { %v246_v58 = vsel %vm171_vm2, %v245_v57, %v241_v56 }
 0x3eb   :  { %248 = vst.msk [vmem:[#allocation7] sm:$0x3] %vm174_vm3, %v246_v58 }
 0x3ec   :  { %363 = shalt.err (!%p360_p6)
}
 0x3ed   :  { %s364_s20 = scalar_lea.hbm %s463_s4, 32 }
 0x3ee   :  { %p365_p7 = scmp.ne.s32.totalorder %s463_s4, %s364_s20  ;;  %p368_p8 = scmp.lt.u32.totalorder %s364_s20, %s463_s4 }
 0x3f0   :  { %p370_p9 = pnand %p368_p8, %p365_p7 }
 0x3f2   :  { %373 = shalt.err (!%p370_p9)
}
 0x3f3   :  { %258 = dma.vmem_to_hbm [thread:$0]  %s256_s3, 32, %s463_s4, [#allocation4]  }
 0x3f4   :  { %378 = dma.done.wait [#allocation4], 32  }
 0x3f5   :  { %379 = vsyncadd [#allocation4], 4294967264 }
 0x3f6   :  { %262 = vsyncpa [#allocation3], 1 }
 0x3f7   :  { %263 = vsyncpa [#allocation6], 1 }
 0x3f8   :  { %264 = vsyncpa [#allocation4], 1 }

</bundles_post_ra>
